<compile_context>
chip_gen: v6e
topology: v6e:2x2x1
jax: 0.10.0
libtpu: 0.0.40
codegen_flags: <defaults>
</compile_context>

<pallas_src>
import math
import warnings
from functools import partial

import numpy as np
import jax
import jax.numpy as jnp
from jax.experimental import pallas as pl
from jax.experimental.pallas import tpu as pltpu

# ----------------------------- tunables -------------------------------------
_DEFAULT_MAX_TILE_BYTES = 8 * 1024 * 1024   # 4-8 MiB ≈ HBM roofline on v5e-v7x
_SMALL_SLAB_BYTES = 512 * 1024              # below this, one block is cheapest
_MIN_GRID_STEPS = 4                         # pipelining + v7x megacore sharding
_SUBLANE_ALIGN = 32                         # full packed vregs (f32/bf16/int8)
_VMEM_LIMIT_FLOOR = 16 * 1024 * 1024
_VMEM_LIMIT_CAP = 48 * 1024 * 1024          # safe under v7x's 64 MiB physical


def _copy_kernel(x_ref, o_ref):
    # UnFlatten has no arithmetic; faithfully copy the tile (vld/vst only).
    o_ref[...] = x_ref[...]


def _pick_tile_rows(rows, row_bytes, max_tile_bytes):
    """Choose a tile row count: 32-aligned, <= max_tile_bytes, >= _MIN_GRID_STEPS
    grid steps for non-tiny slabs (so the DMA pipeline and both v7x TCs run)."""
    total_bytes = rows * row_bytes
    if total_bytes <= _SMALL_SLAB_BYTES or rows < 2 * _SUBLANE_ALIGN:
        # Tiny slab: single full-extent block (full dim satisfies (8,128) rule).
        return rows
    cap_rows = max(_SUBLANE_ALIGN,
                   (max_tile_bytes // row_bytes) // _SUBLANE_ALIGN * _SUBLANE_ALIGN)
    step_rows = max(_SUBLANE_ALIGN,
                    (pl.cdiv(rows, _MIN_GRID_STEPS) // _SUBLANE_ALIGN)
                    * _SUBLANE_ALIGN)
    return min(rows, cap_rows, step_rows)


def _pallas_identity_copy(slab, *, max_tile_bytes=_DEFAULT_MAX_TILE_BYTES,
                          input_buffers=2):
    """Tiled, pipelined identity copy of a lane-dense 2D slab (rows, lane)."""
    rows, lane = slab.shape
    itemsize = jnp.dtype(slab.dtype).itemsize
    row_bytes = lane * itemsize

    tile_rows = _pick_tile_rows(rows, row_bytes, max_tile_bytes)
    grid_steps = pl.cdiv(rows, tile_rows)
    tile_bytes = tile_rows * row_bytes
    nbytes = rows * row_bytes

    # VMEM budget: (input_buffers + 2) buffers of one tile, plus slack.
    # Explicit so v5e's 16 MiB default scoped limit is lifted and v7x's 64 MiB
    # physical VMEM is never exceeded.
    bufs = input_buffers + 2
    vmem_limit = int(min(_VMEM_LIMIT_CAP,
                         max(_VMEM_LIMIT_FLOOR, bufs * tile_bytes + (2 << 20))))

    in_spec_kwargs = {}
    if input_buffers != 2:
        # Optional deeper inbound pipeline; sweep only where VMEM headroom allows.
        in_spec_kwargs["pipeline_mode"] = pl.Buffered(input_buffers)
    in_spec = pl.BlockSpec((tile_rows, lane), lambda i: (i, 0), **in_spec_kwargs)

    return pl.pallas_call(
        _copy_kernel,
        out_shape=jax.ShapeDtypeStruct((rows, lane), slab.dtype),
        grid=(grid_steps,),
        in_specs=[in_spec],
        out_specs=pl.BlockSpec((tile_rows, lane), lambda i: (i, 0)),
        # Identity copy: output may reuse the input's HBM buffer (needs the
        # caller to donate the buffer at the jit boundary to fully kick in).
        input_output_aliases={0: 0},
        cost_estimate=pl.CostEstimate(
            flops=0, transcendentals=0, bytes_accessed=2 * nbytes),
        compiler_params=pltpu.CompilerParams(
            dimension_semantics=("parallel",),
            vmem_limit_bytes=vmem_limit),
    )(slab)


def unflatten(x, shape, *, use_pallas_copy=True,
              max_tile_bytes=_DEFAULT_MAX_TILE_BYTES, input_buffers=2):
    """Pallas-backed equivalent of `x.view(shape)`.

    x:     jnp array with prod(x.shape) == prod(shape)
    shape: target shape, e.g. (B, C, H, W)
    use_pallas_copy=False gives the production metadata-only view (zero bytes).
    """
    total = math.prod(x.shape)
    assert math.prod(shape) == total, "view size mismatch"

    if not use_pallas_copy:
        return jnp.reshape(x, shape)          # true view: metadata only

    # Present the data as a lane-dense slab: last dim a (large) multiple of 128.
    lane = next((w for w in (512, 256, 128) if total % w == 0), None)

    if lane is not None:
        slab = jnp.reshape(x, (total // lane, lane))      # metadata-only
        copied = _pallas_identity_copy(slab, max_tile_bytes=max_tile_bytes,
                                       input_buffers=input_buffers)
        return jnp.reshape(copied, shape)                  # metadata-only view

    # Awkward sizes (element count not a multiple of 128): pad to a lane
    # multiple, run the same pipelined unmasked-store path, then slice.
    lane = 128
    padded_total = pl.cdiv(total, lane) * lane
    flat = jnp.reshape(x, (total,))
    flat = jnp.pad(flat, (0, padded_total - total))
    slab = jnp.reshape(flat, (padded_total // lane, lane))
    copied = _pallas_identity_copy(slab, max_tile_bytes=max_tile_bytes,
                                   input_buffers=input_buffers)
    out = jnp.reshape(copied, (padded_total,))[:total]
    return jnp.reshape(out, shape)


# Donated jit entry point: donating the input buffer lets the pallas_call's
# input_output_aliases actually alias (2N HBM bytes instead of 3N).
@partial(jax.jit, static_argnums=(1,), donate_argnums=(0,))
def unflatten_donated(x, shape):
    return unflatten(x, shape)


if __name__ == "__main__":
    # Donation that cannot be honored only triggers a warning; keep output clean.
    warnings.filterwarnings("ignore", message="Some donated buffers were not usable")

    key = jax.random.PRNGKey(0)

    # Case 1: tiny AE latent, F = C*H*W = 4*4*4 = 64 (single-block path).
    B, C, H, W = 2, 4, 4, 4
    x1 = jax.random.normal(key, (B, C * H * W), dtype=jnp.float32)
    shp1 = (B, C, H, W)
    ref1 = np.asarray(x1).reshape(shp1)                 # host copy before donation
    y1 = jax.block_until_ready(unflatten_donated(x1, shp1))
    assert y1.shape == shp1 and y1.dtype == jnp.float32
    assert np.array_equal(np.asarray(y1), ref1), "mismatch (case 1)"

    # Case 2: typical AE decoder input, lane-dense path.
    B2, C2, H2, W2 = 8, 8, 16, 16
    x2 = jax.random.normal(jax.random.PRNGKey(1), (B2, C2 * H2 * W2),
                           dtype=jnp.float32)
    shp2 = (B2, C2, H2, W2)
    ref2 = np.asarray(x2).reshape(shp2)
    y2 = jax.block_until_ready(unflatten_donated(x2, shp2))
    assert y2.shape == shp2
    assert np.array_equal(np.asarray(y2), ref2), "mismatch (case 2)"

    # Case 3: ~1 MiB slab -> exercises the multi-step (>=4) pipelined grid.
    B3, C3, H3, W3 = 4, 16, 64, 64
    x3 = jax.random.normal(jax.random.PRNGKey(2), (B3, C3 * H3 * W3),
                           dtype=jnp.float32)
    shp3 = (B3, C3, H3, W3)
    ref3 = np.asarray(x3).reshape(shp3)
    y3 = jax.block_until_ready(unflatten_donated(x3, shp3))
    assert y3.shape == shp3
    assert np.array_equal(np.asarray(y3), ref3), "mismatch (case 3)"

    # Case 4: element count not a multiple of 128 -> pad-and-tile fallback.
    x4 = jax.random.normal(jax.random.PRNGKey(3), (3, 105), dtype=jnp.float32)
    shp4 = (3, 5, 7, 3)
    ref4 = np.asarray(x4).reshape(shp4)
    y4 = jax.block_until_ready(unflatten(x4, shp4))
    assert y4.shape == shp4
    assert np.array_equal(np.asarray(y4), ref4), "mismatch (case 4)"

    # Case 5: production fast path (metadata-only view, no Pallas copy).
    x5 = jax.random.normal(jax.random.PRNGKey(4), (2, 64), dtype=jnp.float32)
    y5 = jax.block_until_ready(unflatten(x5, (2, 4, 4, 4), use_pallas_copy=False))
    assert np.array_equal(np.asarray(y5), np.asarray(x5).reshape(2, 4, 4, 4))

    print("KERNEL_OK")
</pallas_src>

<mosaic_0001>
module attributes {stable_mosaic.version = 11 : i64} {
  func.func @_copy_kernel(%arg0: i32, %arg1: memref<1x128xf32, #tpu.memory_space<vmem>>, %arg2: memref<1x128xf32, #tpu.memory_space<vmem>>) attributes {dimension_semantics = [#tpu.dimension_semantics<parallel>], iteration_bounds = array<i64: 1>, scalar_prefetch = 0 : i64, scratch_operands = 0 : i64, tpu.core_type = #tpu.core_type<tc>, window_params = [{transform_indices = @transform_0, window_bounds = array<i64: 1, 128>}, {transform_indices = @transform_1, window_bounds = array<i64: 1, 128>}]} {
    %c0 = arith.constant 0 : index
    %c0_0 = arith.constant 0 : index
    %0 = vector.load %arg1[%c0, %c0_0] : memref<1x128xf32, #tpu.memory_space<vmem>>, vector<1x128xf32>
    %c0_1 = arith.constant 0 : index
    %c0_2 = arith.constant 0 : index
    %1 = vector.load %arg2[%c0_1, %c0_2] : memref<1x128xf32, #tpu.memory_space<vmem>>, vector<1x128xf32>
    tpu.vector_store %arg2[%c0_1, %c0_2], %0 {strides = array<i32>} : memref<1x128xf32, #tpu.memory_space<vmem>>, vector<1x128xf32>,
    return
  }
  func.func @transform_0(%arg0: i32) -> (i32, i32) {
    %c0_i32 = arith.constant 0 : i32
    %c0_i32_0 = arith.constant 0 : i32
    return %arg0, %c0_i32 : i32, i32
  }
  func.func @transform_1(%arg0: i32) -> (i32, i32) {
    %c0_i32 = arith.constant 0 : i32
    %c0_i32_0 = arith.constant 0 : i32
    return %arg0, %c0_i32 : i32, i32
  }
}

</mosaic_0001>

<bundles_post_ra>
// kernel: unflatten_donated.1
= control target key start
LH: loop header
LB: loop body
LE: loop exit
PB: predicated region body
PF: predicated region fallthrough
CT: control target
= control target key end

     0   :  { %s30_s0 = inlined_call_operand.vmem [shape: f32[1,128], index: 0, kind: input, shape index: {}, may-alias: {0,1}]   ;;  %s31_s1 = inlined_call_operand.vmem [shape: f32[1,128], index: 1, kind: output, shape index: {}, may-alias: {0,1}]  }
   0x1   :  { %v8_v0 = vld [vmem:[%s30_s0] sm:$0x1] }
   0x2   :  { %9 = vst [vmem:[%s31_s1] sm:$0x1] %v8_v0 }

</bundles_post_ra>
